<compile_context>
chip_gen: v5e
topology: v5e:2x2
jax: 0.10.0
libtpu: 0.0.40
codegen_flags: <defaults>
</compile_context>

<pallas_src>
import functools

import jax
import jax.numpy as jnp
from jax.experimental import pallas as pl
from jax.experimental.pallas import tpu as pltpu

# ----------------------------- configuration --------------------------------
BATCH = 2
SEQLEN = 8
HIDDEN = 32          # hidden_units
DROPOUT_RATE = 0.2   # unused at inference (identity)

_LANES = 128
_SUBLANES = 8


def _round_up(v, m):
    return ((v + m - 1) // m) * m


# ------------------------------- kernel --------------------------------------
def ffn_kernel(x_ref, w1t_ref, b1_ref, w2t_ref, b2_ref, out_ref):
    """Fused pointwise FFN: out = relu(x @ W1.T + b1) @ W2.T + b2 + x.

    x_ref/out_ref : (bn, H)  -- batch*seq folded into the matmul row dimension
    w1t_ref/w2t_ref: (H, H)  -- weights PRE-TRANSPOSED in the wrapper (canonical (K,N) RHS)
    b1_ref/b2_ref : (1, H)
    """
    x = x_ref[...]                                                   # (bn, H) f32

    # conv1 (k=1): x @ W1.T == x @ w1t   (MXU, f32 accumulation), then bias + ReLU (VPU)
    h = jax.lax.dot_general(
        x, w1t_ref[...], (((1,), (0,)), ((), ())),
        preferred_element_type=jnp.float32) + b1_ref[...]
    h = jnp.maximum(h, 0.0)

    # conv2 (k=1): h @ W2.T == h @ w2t
    y = jax.lax.dot_general(
        h, w2t_ref[...], (((1,), (0,)), ((), ())),
        preferred_element_type=jnp.float32) + b2_ref[...]

    # residual (elementwise math stays f32: safe on v5e, which has no bf16 VPU)
    out_ref[...] = (y + x).astype(out_ref.dtype)


# ------------------------------- wrapper --------------------------------------
@functools.partial(jax.jit, static_argnames=("block_rows",))
def pointwise_ffn(x, w1, b1, w2, b2, block_rows=2048):
    """x: (B, L, H) float32. Conv1d(k=1) weights w1/w2: (out, in). Returns (B, L, H)."""
    B, L, H = x.shape
    N = B * L
    dtype = jnp.float32

    x2 = x.reshape(N, H).astype(dtype)
    # Pre-transpose once (grid-invariant 32x32): MXU gets a canonical (K, N) RHS.
    w1t = jnp.transpose(w1).astype(dtype)
    w2t = jnp.transpose(w2).astype(dtype)
    b1r = b1.reshape(1, H).astype(jnp.float32)
    b2r = b2.reshape(1, H).astype(jnp.float32)

    # Row-block size: whole problem in one block when it fits; otherwise a sublane-aligned
    # block. N > block_rows guarantees >= 2 grid steps, so the "parallel" axis can shard
    # across both v7x TensorCores at large N.
    if N <= block_rows:
        bn = N
    else:
        bn = _round_up(min(block_rows, N), _SUBLANES)
    grid = (pl.cdiv(N, bn),)

    # VMEM budget with lane padding: last dim H=32 pads to 128 lanes, so one (bn, H) f32
    # block occupies bn*128*4 bytes. x + out, each double-buffered -> 4x that; weights/bias
    # are tiny but also lane-padded. Clamp to stay inside every generation's safe range.
    itemsize = jnp.dtype(dtype).itemsize
    padded_h = _round_up(H, _LANES)
    act_bytes = 4 * bn * padded_h * itemsize                      # x + out, double-buffered
    w_bytes = 2 * 2 * (_round_up(H, _SUBLANES) + 1) * padded_h * 4  # W1/W2 + b1/b2, 2 bufs
    vmem_limit = int(min(max(act_bytes + w_bytes + (2 << 20), 16 << 20), 48 << 20))

    out = pl.pallas_call(
        ffn_kernel,
        out_shape=jax.ShapeDtypeStruct((N, H), dtype),
        grid=grid,
        in_specs=[
            pl.BlockSpec((bn, H), lambda i: (i, 0)),   # activations, row-blocked
            pl.BlockSpec((H, H), lambda i: (0, 0)),    # W1^T resident in VMEM
            pl.BlockSpec((1, H), lambda i: (0, 0)),    # b1
            pl.BlockSpec((H, H), lambda i: (0, 0)),    # W2^T
            pl.BlockSpec((1, H), lambda i: (0, 0)),    # b2
        ],
        out_specs=pl.BlockSpec((bn, H), lambda i: (i, 0)),
        compiler_params=pltpu.CompilerParams(
            dimension_semantics=("parallel",),
            vmem_limit_bytes=vmem_limit),
    )(x2, w1t, b1r, w2t, b2r)
    return out.reshape(B, L, H)


# ------------------------------ reference -------------------------------------
def reference_ffn(x, w1, b1, w2, b2):
    """Pure-JAX reference matching the PyTorch module (dropout = identity)."""
    h = jnp.maximum(jnp.einsum("blh,oh->blo", x, w1) + b1, 0.0)
    y = jnp.einsum("blh,oh->blo", h, w2) + b2
    return y + x


# --------------------------------- main ----------------------------------------
if __name__ == "__main__":
    key = jax.random.PRNGKey(0)
    kx, kw1, kb1, kw2, kb2 = jax.random.split(key, 5)

    H = HIDDEN
    x = jax.random.normal(kx, (BATCH, SEQLEN, H), dtype=jnp.float32)
    # Conv1d(k=1) weights: (out_channels, in_channels) after squeezing the kernel dim.
    w1 = (0.1 * jax.random.normal(kw1, (H, H))).astype(jnp.float32)
    b1 = (0.05 * jax.random.normal(kb1, (H,))).astype(jnp.float32)
    w2 = (0.1 * jax.random.normal(kw2, (H, H))).astype(jnp.float32)
    b2 = (0.05 * jax.random.normal(kb2, (H,))).astype(jnp.float32)

    out = pointwise_ffn(x, w1, b1, w2, b2)
    jax.block_until_ready(out)

    ref = reference_ffn(x, w1, b1, w2, b2)
    assert out.shape == (BATCH, SEQLEN, H)
    assert jnp.allclose(out, ref, atol=1e-5, rtol=1e-5), "mismatch vs reference"
    print("KERNEL_OK")
</pallas_src>

<mosaic_0001>
module attributes {stable_mosaic.version = 11 : i64} {
  func.func @ffn_kernel(%arg0: i32, %arg1: memref<16x32xf32, #tpu.memory_space<vmem>>, %arg2: memref<32x32xf32, #tpu.memory_space<vmem>>, %arg3: memref<1x32xf32, #tpu.memory_space<vmem>>, %arg4: memref<32x32xf32, #tpu.memory_space<vmem>>, %arg5: memref<1x32xf32, #tpu.memory_space<vmem>>, %arg6: memref<16x32xf32, #tpu.memory_space<vmem>>) attributes {dimension_semantics = [#tpu.dimension_semantics<parallel>], iteration_bounds = array<i64: 1>, scalar_prefetch = 0 : i64, scratch_operands = 0 : i64, tpu.core_type = #tpu.core_type<tc>, window_params = [{transform_indices = @transform_0, window_bounds = array<i64: 16, 32>}, {pipeline_mode = #tpu.pipeline_mode<synchronous>, transform_indices = @transform_1, window_bounds = array<i64: 32, 32>}, {pipeline_mode = #tpu.pipeline_mode<synchronous>, transform_indices = @transform_2, window_bounds = array<i64: 1, 32>}, {pipeline_mode = #tpu.pipeline_mode<synchronous>, transform_indices = @transform_3, window_bounds = array<i64: 32, 32>}, {pipeline_mode = #tpu.pipeline_mode<synchronous>, transform_indices = @transform_4, window_bounds = array<i64: 1, 32>}, {transform_indices = @transform_5, window_bounds = array<i64: 16, 32>}]} {
    %c0 = arith.constant 0 : index
    %c0_0 = arith.constant 0 : index
    %0 = vector.load %arg1[%c0, %c0_0] : memref<16x32xf32, #tpu.memory_space<vmem>>, vector<16x32xf32>
    %c0_1 = arith.constant 0 : index
    %c0_2 = arith.constant 0 : index
    %1 = vector.load %arg2[%c0_1, %c0_2] : memref<32x32xf32, #tpu.memory_space<vmem>>, vector<32x32xf32>
    %cst = arith.constant dense<0.000000e+00> : vector<16x32xf32>
    %2 = tpu.matmul %0, %1, %cst {dimension_numbers = #tpu.dot_dimension_numbers<[1], [0], [0], [1], [0, 0, 1, 1], [], []>} : vector<16x32xf32>, vector<32x32xf32>, vector<16x32xf32> -> vector<16x32xf32>
    %c0_3 = arith.constant 0 : index
    %c0_4 = arith.constant 0 : index
    %3 = vector.load %arg3[%c0_3, %c0_4] : memref<1x32xf32, #tpu.memory_space<vmem>>, vector<1x32xf32>
    %4 = vector.broadcast %3 : vector<1x32xf32> to vector<16x32xf32>
    %5 = arith.addf %2, %4 : vector<16x32xf32>
    %cst_5 = arith.constant 0.000000e+00 : f32
    %6 = vector.broadcast %cst_5 : f32 to vector<16x32xf32>
    %7 = arith.maximumf %5, %6 : vector<16x32xf32>
    %c0_6 = arith.constant 0 : index
    %c0_7 = arith.constant 0 : index
    %8 = vector.load %arg4[%c0_6, %c0_7] : memref<32x32xf32, #tpu.memory_space<vmem>>, vector<32x32xf32>
    %cst_8 = arith.constant dense<0.000000e+00> : vector<16x32xf32>
    %9 = tpu.matmul %7, %8, %cst_8 {dimension_numbers = #tpu.dot_dimension_numbers<[1], [0], [0], [1], [0, 0, 1, 1], [], []>} : vector<16x32xf32>, vector<32x32xf32>, vector<16x32xf32> -> vector<16x32xf32>
    %c0_9 = arith.constant 0 : index
    %c0_10 = arith.constant 0 : index
    %10 = vector.load %arg5[%c0_9, %c0_10] : memref<1x32xf32, #tpu.memory_space<vmem>>, vector<1x32xf32>
    %11 = vector.broadcast %10 : vector<1x32xf32> to vector<16x32xf32>
    %12 = arith.addf %9, %11 : vector<16x32xf32>
    %13 = arith.addf %12, %0 : vector<16x32xf32>
    %c0_11 = arith.constant 0 : index
    %c0_12 = arith.constant 0 : index
    %14 = vector.load %arg6[%c0_11, %c0_12] : memref<16x32xf32, #tpu.memory_space<vmem>>, vector<16x32xf32>
    tpu.vector_store %arg6[%c0_11, %c0_12], %13 {strides = array<i32>} : memref<16x32xf32, #tpu.memory_space<vmem>>, vector<16x32xf32>,
    return
  }
  func.func @transform_0(%arg0: i32) -> (i32, i32) {
    %c0_i32 = arith.constant 0 : i32
    %c0_i32_0 = arith.constant 0 : i32
    return %arg0, %c0_i32 : i32, i32
  }
  func.func @transform_1(%arg0: i32) -> (i32, i32) {
    %c0_i32 = arith.constant 0 : i32
    %c0_i32_0 = arith.constant 0 : i32
    %c0_i32_1 = arith.constant 0 : i32
    return %c0_i32, %c0_i32_0 : i32, i32
  }
  func.func @transform_2(%arg0: i32) -> (i32, i32) {
    %c0_i32 = arith.constant 0 : i32
    %c0_i32_0 = arith.constant 0 : i32
    %c0_i32_1 = arith.constant 0 : i32
    return %c0_i32, %c0_i32_0 : i32, i32
  }
  func.func @transform_3(%arg0: i32) -> (i32, i32) {
    %c0_i32 = arith.constant 0 : i32
    %c0_i32_0 = arith.constant 0 : i32
    %c0_i32_1 = arith.constant 0 : i32
    return %c0_i32, %c0_i32_0 : i32, i32
  }
  func.func @transform_4(%arg0: i32) -> (i32, i32) {
    %c0_i32 = arith.constant 0 : i32
    %c0_i32_0 = arith.constant 0 : i32
    %c0_i32_1 = arith.constant 0 : i32
    return %c0_i32, %c0_i32_0 : i32, i32
  }
  func.func @transform_5(%arg0: i32) -> (i32, i32) {
    %c0_i32 = arith.constant 0 : i32
    %c0_i32_0 = arith.constant 0 : i32
    return %arg0, %c0_i32 : i32, i32
  }
}

</mosaic_0001>

<bundles_post_ra>
// kernel: pointwise_ffn.1
= control target key start
LH: loop header
LB: loop body
LE: loop exit
PB: predicated region body
PF: predicated region fallthrough
CT: control target
= control target key end

     0   :  { %s243_s0 = inlined_call_operand.vmem [shape: f32[16,32], index: 0, kind: input, shape index: {}]   ;;  %s244_s1 = inlined_call_operand.vmem [shape: f32[32,32], index: 1, kind: input, shape index: {}]   ;;  %s245_s2 = inlined_call_operand.vmem [shape: f32[1,32], index: 2, kind: input, shape index: {}]   ;;  %s246_s3 = inlined_call_operand.vmem [shape: f32[32,32], index: 3, kind: input, shape index: {}]   ;;  %s247_s4 = inlined_call_operand.vmem [shape: f32[1,32], index: 4, kind: input, shape index: {}]   ;;  %s248_s5 = inlined_call_operand.hbm [shape: f32[16,32], index: 5, kind: output, shape index: {}]  }
   0x1   :  { %v26_v0 = vld [vmem:[%s244_s1 + $0x18] sm:$0xff]  ;;  %v25_v1 = vld [vmem:[%s244_s1 + $0x10] sm:$0xff]  ;;  %v24_v2 = vld [vmem:[%s244_s1 + $0x8] sm:$0xff] }
   0x2   :  { %126 = vmatpush.msra.mxu2 %v26_v0  ;;  %50 = vmatpush.msra.mxu0 %v26_v0  ;;  %v66_v3 = vld [vmem:[%s246_s3 + $0x18] sm:$0xff] }
   0x4   :  { %127 = vmatpush.msra.mxu2 %v25_v1  ;;  %51 = vmatpush.msra.mxu0 %v25_v1 }
   0x5   :  { %10 = vsyncpa [#allocation3], 0  ;;  %v23_v4 = vld [vmem:[%s244_s1] sm:$0xff]  ;;  %130 = vmatpush.msra.mxu3 %v66_v3  ;;  %89 = vmatpush.msra.mxu1 %v66_v3  ;;  %v22_v5 = vld [vmem:[%s243_s0 + $0x8] sm:$0xff]  ;;  %vm31_vm0 = vcmask 261120   ;;  %s110_s17 = sshll.u32 %s248_s5, 4  ;;  %s111_s17 = int_to_ptr.hbm [resolvable:$true] %s110_s17 }
   0x6   :  { %128 = vmatpush.msra.mxu2 %v24_v2  ;;  %52 = vmatpush.msra.mxu0 %v24_v2  ;;  %v21_v6 = vld [vmem:[%s243_s0] sm:$0xff]  ;;  %v65_v7 = vld [vmem:[%s246_s3 + $0x10] sm:$0xff]  ;;  %v64_v8 = vld [vmem:[%s246_s3 + $0x8] sm:$0xff]  ;;  %s166_s18 = smov 128  }
   0x7   :  { %131 = vmatpush.msra.mxu3 %v65_v7  ;;  %90 = vmatpush.msra.mxu1 %v65_v7  ;;  %v63_v9 = vld [vmem:[%s246_s3] sm:$0xff] }
   0x8   :  { %129 = vmatpush.msra.mxu2 %v23_v4  ;;  %53 = vmatpush.msra.mxu0 %v23_v4  ;;  %v137_v10 = vld [vmem:[%s245_s2] ss:$0 sm:$0xff]  ;;  %s165_s2 = smov [#allocation2]  }
   0x9   :  { %123 = vmatmul.msk.f32.vlgmr.msra.gmra.mxu2 %vm31_vm0, %v22_v5  ;;  %122 = vmatmul.msk.f32.vlgmr.msra.gmra.mxu0 %vm31_vm0, %v21_v6  ;;  %v138_v17 = vld [vmem:[%s247_s4] ss:$0 sm:$0xff]  ;;  %s108_s3 = sshll.u32 %s165_s2, 4  ;;  %s167_s4 = smov 8   ;;  %s109_s3 = int_to_ptr.vmem [resolvable:$true] %s108_s3 }
   0xa   :  { %132 = vmatpush.msra.mxu3 %v64_v8  ;;  %91 = vmatpush.msra.mxu1 %v64_v8 }
   0xc   :  { %133 = vmatpush.msra.mxu3 %v63_v9  ;;  %92 = vmatpush.msra.mxu1 %v63_v9 }
  0x86   :  { %v55_v11 = vpop.f32.mrf.mxu0 }
  0x87   :  { %v56_v12 = vadd.f32 %v137_v10, %v55_v11 }
  0x89   :  { %v61_v13 = vmax.f32 %v56_v12, 0.0 }
  0x8b   :  { %124 = vmatmul.msk.f32.vlgmr.msra.gmra.mxu1 %vm31_vm0, %v61_v13 }
  0x8c   :  { %v58_v14 = vpop.f32.mrf.mxu2 }
  0x8d   :  { %v59_v15 = vadd.f32 %v137_v10, %v58_v14 }
  0x8f   :  { %v62_v16 = vmax.f32 %v59_v15, 0.0 }
  0x91   :  { %125 = vmatmul.msk.f32.vlgmr.msra.gmra.mxu3 %vm31_vm0, %v62_v16 }
 0x108   :  { %v94_v18 = vpop.f32.mrf.mxu1 }
 0x109   :  { %v95_v19 = vadd.f32 %v138_v17, %v94_v18 }
 0x10b   :  { %v100_v20 = vadd.f32 %v95_v19, %v21_v6 }
 0x10d   :  { %102 = vst.msk [vmem:[#allocation2] sm:$0xff] %vm31_vm0, %v100_v20 }
 0x114   :  { %v97_v21 = vpop.f32.mrf.mxu3 }
 0x115   :  { %v98_v22 = vadd.f32 %v138_v17, %v97_v21 }
 0x117   :  { %v101_v23 = vadd.f32 %v98_v22, %v22_v5 }
 0x119   :  { %103 = vst.msk [vmem:[#allocation2 + $0x8] sm:$0xff] %vm31_vm0, %v101_v23 }
 0x11a   :  { %116 = dma.vmem_to_hbm [thread:$0]  %s109_s3, 256, %s111_s17, [#allocation3], %s166_s18, %s166_s18, %s167_s4  }
 0x11b   :  { %163 = dma.done.wait [#allocation3], 256  }
 0x11c   :  { %164 = vsyncadd [#allocation3], 4294967040 }
 0x11d   :  { %121 = vsyncpa [#allocation3], 1 }

</bundles_post_ra>
